<compile_context>
chip_gen: v5e
topology: v5e:2x2
jax: 0.10.0
libtpu: 0.0.40
codegen_flags: <defaults>
</compile_context>

<pallas_src>
import functools

import jax
import jax.numpy as jnp
import numpy as np
from jax.experimental import pallas as pl
from jax.experimental.pallas import tpu as pltpu


_VMEM_LIMIT = 32 * 1024 * 1024     # safe on v5e/v6e (128 MiB) and v7x (64 MiB)
_LANES = 128


# --------------------------------------------------------------------------
# tiling / grid helpers
# --------------------------------------------------------------------------
def _row_tile(n, per_row_bytes, budget=6 << 20):
    """Largest multiple-of-8 divisor of n whose (double-buffered) block stays
    within `budget`. Falls back to the full n (block == array is layout-legal)."""
    cap = max(8, budget // max(per_row_bytes, 1))
    best = None
    for t in range(8, min(n, 2048) + 1, 8):
        if n % t == 0 and t <= cap:
            best = t
    return best if best is not None else n


def _beam_batch_tile(b, k, per_batch_bytes, budget=12 << 20, max_bt=16):
    """Batch elements per beam-kernel block: Bt | B, Bt*K a multiple of 8
    sublanes (or Bt == B, which is always layout-legal), block + working set
    within `budget`, Bt capped to bound static unrolling of stage 2."""
    cap = max(1, min(max_bt, budget // max(per_batch_bytes, 1)))
    aligned = [d for d in range(1, b + 1)
               if b % d == 0 and ((d * k) % 8 == 0 or d == b)]
    within = [d for d in aligned if d <= cap]
    if within:
        return max(within)
    return min(aligned)            # `aligned` always contains d == b


@functools.lru_cache(maxsize=None)
def _core_parallel_ok():
    """True if CORE_PARALLEL grid semantics compile+run on this chip.
    Only probed on v7x-like devices (2 TCs/chip); plain "parallel" does not
    actually shard the grid across TensorCores."""
    cp = getattr(pltpu, "CORE_PARALLEL", None)
    if cp is None:
        return False
    try:
        kind = jax.devices()[0].device_kind.lower()
    except Exception:
        return False
    if not any(tag in kind for tag in ("v7", "7x", "tpu7")):
        return False
    try:
        def _probe(x_ref, o_ref):
            o_ref[...] = x_ref[...] + 1.0
        y = pl.pallas_call(
            _probe, grid=(2,),
            in_specs=[pl.BlockSpec((8, 128), lambda i: (i, 0))],
            out_specs=pl.BlockSpec((8, 128), lambda i: (i, 0)),
            out_shape=jax.ShapeDtypeStruct((16, 128), jnp.float32),
            compiler_params=pltpu.CompilerParams(dimension_semantics=(cp,)),
        )(jnp.zeros((16, 128), jnp.float32))
        return bool(jnp.all(y == 1.0))
    except Exception:
        return False


def _grid_semantics(n_steps):
    if n_steps >= 2 and n_steps % 2 == 0 and _core_parallel_ok():
        return (pltpu.CORE_PARALLEL,)
    return ("parallel",)


# --------------------------------------------------------------------------
# Kernels
# --------------------------------------------------------------------------
def _log_softmax_kernel(x_ref, o_ref, *, inv_temp):
    """Row-wise log_softmax(x * inv_temp); vocab on the lane axis."""
    x = x_ref[...].astype(jnp.float32) * inv_temp
    m = jnp.max(x, axis=-1, keepdims=True)
    e = jnp.exp(x - m)
    o_ref[...] = (x - m - jnp.log(jnp.sum(e, axis=-1, keepdims=True))
                  ).astype(o_ref.dtype)


def _greedy_sample_kernel(lp_ref, it_ref, slp_ref):
    """torch.max(logprobs, dim=1): value + first argmax per row.
    Outputs are 128-lane slabs (lane-dense stores); wrapper slices col 0."""
    lp = lp_ref[...].astype(jnp.float32)                    # (TN, V)
    tn, v = lp.shape
    lanes = it_ref.shape[-1]
    m = jnp.max(lp, axis=1, keepdims=True)                  # (TN, 1)
    voc = jax.lax.broadcasted_iota(jnp.int32, (tn, v), 1)
    idx = jnp.min(jnp.where(lp == m, voc, v), axis=1, keepdims=True)
    it_ref[...] = jnp.broadcast_to(idx, (tn, lanes)).astype(jnp.int32)
    slp_ref[...] = jnp.broadcast_to(m, (tn, lanes))


def _beam_kernel(x_ref, bls_ref, *out_refs, inv_temp, beam_size, k_beams,
                 apply_log_softmax, emit_logprobs):
    """Fused beam-step core over a block of Bt batch elements.

    Per grid step (Rt = Bt*K rows of the (B*K, V) row view):
      optionally: lp = log_softmax(x * inv_temp)           (written back)
      cand = lp + beam_logprobs_sum[:, None]                       (Rt, V)
      stage 1: per-row lane-only top-`beam_size` over V           -> (Rt, S)
      stage 2: per batch element, combine K*S survivors -> top-S  -> (Bt, S)
    ys (values) and ix (flat k*V + v indices) are written as 128-lane slabs.
    """
    if emit_logprobs:
        lp_ref, ys_ref, ix_ref = out_refs
    else:
        ys_ref, ix_ref = out_refs

    x = x_ref[...].astype(jnp.float32)                      # (Rt, V)
    r, v = x.shape
    k = k_beams
    s = beam_size
    bt = r // k
    neg_inf = jnp.float32(-jnp.inf)
    neg_big = jnp.float32(-1e30)

    if apply_log_softmax:
        x = x * inv_temp
        m = jnp.max(x, axis=-1, keepdims=True)
        lp = x - m - jnp.log(jnp.sum(jnp.exp(x - m), axis=-1, keepdims=True))
    else:
        lp = x
    if emit_logprobs:
        lp_ref[...] = lp.astype(lp_ref.dtype)

    cand = lp + bls_ref[...].astype(jnp.float32)            # (Rt,V)+(Rt,1)
    # One pass that (a) clamps to -1e30 so the -inf used to mask picked
    # indices below is strictly smaller than any live candidate (keeps the
    # "never re-select a picked index" property without a bool array) and
    # (b) sanitizes NaN (NaN >= x is False -> becomes -1e30).
    w = jnp.where(cand >= neg_big, cand, neg_big)

    # ---- stage 1: per-row (per-beam) top-`beam_size` over vocab ----------
    voc = jax.lax.broadcasted_iota(jnp.int32, (r, v), 1)
    lane_s = jax.lax.broadcasted_iota(jnp.int32, (r, s), 1)
    svals = jnp.full((r, s), neg_inf, jnp.float32)
    sidx = jnp.zeros((r, s), jnp.int32)
    for j in range(s):                                       # static unroll
        mj = jnp.max(w, axis=-1, keepdims=True)              # (Rt, 1)
        hit = w == mj
        ij = jnp.min(jnp.where(hit, voc, v), axis=-1, keepdims=True)
        svals = jnp.where(lane_s == j, mj, svals)
        sidx = jnp.where(lane_s == j, ij, sidx)
        w = jnp.where(voc == ij, neg_inf, w)                 # mask by index

    # flat candidate index  beam*V + vocab  (int32; fine unless K*V ~ 2^31)
    beam_in_batch = jax.lax.broadcasted_iota(jnp.int32, (r, s), 0) % k
    sflat = beam_in_batch * v + sidx                         # (Rt, S)

    # ---- stage 2: per batch element, combine its K*S survivors -----------
    kb_pos = (jax.lax.broadcasted_iota(jnp.int32, (k, s), 0) * s
              + jax.lax.broadcasted_iota(jnp.int32, (k, s), 1))
    pad = ys_ref.shape[-1]
    lane_out = jax.lax.broadcasted_iota(jnp.int32, (1, pad), 1)
    nks = k * s
    for g in range(bt):                                      # tiny, capped
        sv_g = svals[g * k:(g + 1) * k, :]                   # (K, S)
        sf_g = sflat[g * k:(g + 1) * k, :]                   # (K, S)
        w2 = sv_g
        ys_row = jnp.full((1, pad), neg_inf, jnp.float32)
        ix_row = jnp.zeros((1, pad), jnp.int32)
        for j in range(s):
            m2 = jnp.max(w2, axis=(0, 1), keepdims=True)     # (1,1)
            hit2 = w2 == m2
            p2 = jnp.min(jnp.where(hit2, kb_pos, nks), axis=(0, 1),
                         keepdims=True)
            sel = kb_pos == p2                               # one-hot (K,S)
            flat_j = jnp.sum(jnp.where(sel, sf_g, 0), axis=(0, 1),
                             keepdims=True)
            ys_row = jnp.where(lane_out == j, m2, ys_row)
            ix_row = jnp.where(lane_out == j, flat_j, ix_row)
            w2 = jnp.where(sel, neg_inf, w2)
        ys_ref[pl.ds(g, 1), 0, :] = ys_row
        ix_ref[pl.ds(g, 1), 0, :] = ix_row


# --------------------------------------------------------------------------
# pallas_call wrappers
# --------------------------------------------------------------------------
def pallas_log_softmax(logits, temperature=1.0, out_dtype=jnp.float32):
    n, v = logits.shape
    per_row = v * (logits.dtype.itemsize + jnp.dtype(out_dtype).itemsize) * 2
    tn = _row_tile(n, per_row)
    grid = (n // tn,)
    return pl.pallas_call(
        functools.partial(_log_softmax_kernel,
                          inv_temp=float(1.0 / temperature)),
        grid=grid,
        in_specs=[pl.BlockSpec((tn, v), lambda i: (i, 0))],
        out_specs=pl.BlockSpec((tn, v), lambda i: (i, 0)),
        out_shape=jax.ShapeDtypeStruct((n, v), out_dtype),
        compiler_params=pltpu.CompilerParams(
            dimension_semantics=_grid_semantics(grid[0]),
            vmem_limit_bytes=_VMEM_LIMIT),
    )(logits)


def pallas_greedy_sample(logprobs):
    n, v = logprobs.shape
    per_row = v * logprobs.dtype.itemsize * 2 + _LANES * 8 * 2
    tn = _row_tile(n, per_row)
    grid = (n // tn,)
    it, slp = pl.pallas_call(
        _greedy_sample_kernel,
        grid=grid,
        in_specs=[pl.BlockSpec((tn, v), lambda i: (i, 0))],
        out_specs=[pl.BlockSpec((tn, _LANES), lambda i: (i, 0)),
                   pl.BlockSpec((tn, _LANES), lambda i: (i, 0))],
        out_shape=[jax.ShapeDtypeStruct((n, _LANES), jnp.int32),
                   jax.ShapeDtypeStruct((n, _LANES), jnp.float32)],
        compiler_params=pltpu.CompilerParams(
            dimension_semantics=_grid_semantics(grid[0]),
            vmem_limit_bytes=_VMEM_LIMIT),
    )(logprobs)
    return it[:, 0], slp[:, 0]


def _beam_pallas_call(x3, bls, beam_size, inv_temp, apply_log_softmax,
                      emit_logprobs, logprobs_dtype=jnp.float32):
    b, k, v = x3.shape
    x2 = x3.reshape(b * k, v)                 # row view: full sublane use
    bls2 = bls.reshape(b * k, 1)
    pad = _LANES

    in_bytes = x2.dtype.itemsize
    lp_bytes = jnp.dtype(logprobs_dtype).itemsize if emit_logprobs else 0
    # double-buffered input (+ logprob output) + ~4 full-width f32/int32
    # in-kernel temporaries (lp, cand/working copy, vocab iota, exp scratch)
    per_batch = k * v * (2 * in_bytes + 2 * lp_bytes + 16)
    bt = _beam_batch_tile(b, k, per_batch)
    rt = bt * k
    grid = (b // bt,)

    kern = functools.partial(
        _beam_kernel, inv_temp=inv_temp, beam_size=beam_size, k_beams=k,
        apply_log_softmax=apply_log_softmax, emit_logprobs=emit_logprobs)

    out_specs, out_shape = [], []
    if emit_logprobs:
        out_specs.append(pl.BlockSpec((rt, v), lambda i: (i, 0)))
        out_shape.append(jax.ShapeDtypeStruct((b * k, v), logprobs_dtype))
    out_specs += [pl.BlockSpec((bt, 1, pad), lambda i: (i, 0, 0)),
                  pl.BlockSpec((bt, 1, pad), lambda i: (i, 0, 0))]
    out_shape += [jax.ShapeDtypeStruct((b, 1, pad), jnp.float32),
                  jax.ShapeDtypeStruct((b, 1, pad), jnp.int32)]

    # TODO(synk): for very large V (>~64k) on v7x's 64 MiB VMEM, additionally
    #   tile the vocab axis with a streaming top-k carry + online logsumexp.
    # TODO(synk): optionally also emit the beam_ix-gathered logprob rows from
    #   the kernel to drop the take_along_axis over (B,K,V) in _finish_beam_step.
    # NOTE: beam_logprobs_sum stays a tiny (Rt,1) VMEM block; rebuilding that
    #   per-row vector from SMEM scalars would cost more VPU selects than the
    #   mini-DMA it saves.
    outs = pl.pallas_call(
        kern,
        grid=grid,
        in_specs=[pl.BlockSpec((rt, v), lambda i: (i, 0)),
                  pl.BlockSpec((rt, 1), lambda i: (i, 0))],
        out_specs=out_specs,
        out_shape=out_shape,
        compiler_params=pltpu.CompilerParams(
            dimension_semantics=_grid_semantics(grid[0]),
            vmem_limit_bytes=_VMEM_LIMIT),
    )(x2, bls2)

    if emit_logprobs:
        lp2, ys, ix = outs
        return lp2.reshape(b, k, v), ys[:, 0, :beam_size], ix[:, 0, :beam_size]
    ys, ix = outs
    return ys[:, 0, :beam_size], ix[:, 0, :beam_size]


def pallas_beam_topk(logprobs3, beam_logprobs_sum, beam_size):
    """top-k over candidate = bls[:, :, None] + logprobs (already normalized)."""
    return _beam_pallas_call(logprobs3, beam_logprobs_sum, beam_size,
                             inv_temp=1.0, apply_log_softmax=False,
                             emit_logprobs=False)


def pallas_fused_beam_step_topk(logits3, beam_logprobs_sum, beam_size,
                                temperature=1.0, logprobs_dtype=jnp.float32):
    """FUSED: log_softmax(logits/T) + candidate-add + top-k in one kernel.
    Returns (logprobs (B,K,V), ys (B,beam), ix (B,beam))."""
    return _beam_pallas_call(logits3, beam_logprobs_sum, beam_size,
                             inv_temp=float(1.0 / temperature),
                             apply_log_softmax=True, emit_logprobs=True,
                             logprobs_dtype=logprobs_dtype)


# --------------------------------------------------------------------------
# CaptionModel (JAX / Pallas version of the mode-dispatching base class)
# --------------------------------------------------------------------------
class CaptionModel:
    def __init__(self, vocab_size=127, max_seq_length=4, eos_idx=0):
        self.vocab_size = vocab_size
        self.max_seq_length = max_seq_length
        self.eos_idx = eos_idx

    # same dispatch semantics as the PyTorch forward()
    def forward(self, *args, **kwargs):
        mode = kwargs.get('mode', 'forward')
        if 'mode' in kwargs:
            del kwargs['mode']
        return getattr(self, '_' + mode)(*args, **kwargs)

    # --- kernelized pieces -------------------------------------------------
    def _log_softmax(self, logits, temperature=1.0):
        return pallas_log_softmax(logits, temperature)

    def _sample_next_word(self, logprobs, sample_method='greedy', temperature=1.0):
        if sample_method == 'greedy':
            it, sample_logprobs = pallas_greedy_sample(logprobs)
            return it, sample_logprobs
        # TODO(synk): gumbel / top-k / top-p sampling need device RNG + a full
        # sort; only the greedy path is kernelized here.
        raise NotImplementedError(sample_method)

    # shared JAX glue after the top-k kernel (gathers / concats, as in torch)
    def _finish_beam_step(self, ys, ix, unaug_logprobs2d, beam_size, t,
                          cur_beams, vocab_size, beam_seq, beam_seq_logprobs,
                          state):
        batch_size = ys.shape[0]
        beam_ix = ix // vocab_size
        selected_ix = ix % vocab_size
        state_ix = (beam_ix
                    + jnp.arange(batch_size, dtype=beam_ix.dtype)[:, None]
                    * cur_beams).reshape(-1)

        if t > 0:
            beam_seq = jnp.take_along_axis(beam_seq, beam_ix[:, :, None], axis=1)
            beam_seq_logprobs = jnp.take_along_axis(
                beam_seq_logprobs, beam_ix[:, :, None, None], axis=1)

        beam_seq = jnp.concatenate(
            [beam_seq, selected_ix[:, :, None].astype(beam_seq.dtype)], axis=-1)
        beam_logprobs_sum = ys
        beam_logprobs = jnp.take_along_axis(
            unaug_logprobs2d.reshape(batch_size, -1, vocab_size),
            beam_ix[:, :, None], axis=1)
        beam_seq_logprobs = jnp.concatenate(
            [beam_seq_logprobs, beam_logprobs[:, :, None, :]], axis=2)
        new_state = [s[:, state_ix] for s in state]
        # TODO(synk): done-beam bookkeeping / length_penalty / diversity and the
        # abstract get_logprobs_state are model-specific Python glue, not kernelized.
        return beam_seq, beam_seq_logprobs, beam_logprobs_sum, new_state

    def _beam_step(self, logprobs, unaug_logprobs, beam_size, t,
                   beam_seq, beam_seq_logprobs, beam_logprobs_sum, state):
        """Mirror of beam_search.beam_step (logprobs already normalized)."""
        batch_size = beam_logprobs_sum.shape[0]
        vocab_size = logprobs.shape[-1]
        lp3 = logprobs.reshape(batch_size, -1, vocab_size)
        if t == 0:
            assert lp3.shape[1] == 1
            beam_logprobs_sum = beam_logprobs_sum[:, :1]
        ys, ix = pallas_beam_topk(lp3, beam_logprobs_sum, beam_size)
        return self._finish_beam_step(
            ys, ix, unaug_logprobs, beam_size, t, lp3.shape[1], vocab_size,
            beam_seq, beam_seq_logprobs, state)

    def _beam_step_fused(self, logits, beam_size, t, beam_seq,
                         beam_seq_logprobs, beam_logprobs_sum, state,
                         temperature=1.0):
        """Fused decode-step path: raw logits in, log_softmax + candidate-add +
        top-k done in ONE Pallas kernel (group_size=1 / no diversity)."""
        batch_size = beam_logprobs_sum.shape[0]
        vocab_size = logits.shape[-1]
        lg3 = logits.reshape(batch_size, -1, vocab_size)
        if t == 0:
            assert lg3.shape[1] == 1
            beam_logprobs_sum = beam_logprobs_sum[:, :1]
        logprobs3, ys, ix = pallas_fused_beam_step_topk(
            lg3, beam_logprobs_sum, beam_size, temperature)
        logprobs2d = logprobs3.reshape(-1, vocab_size)
        seq, seq_lp, lp_sum, new_state = self._finish_beam_step(
            ys, ix, logprobs2d, beam_size, t, lg3.shape[1], vocab_size,
            beam_seq, beam_seq_logprobs, state)
        return seq, seq_lp, lp_sum, new_state, logprobs2d


# --------------------------------------------------------------------------
if __name__ == "__main__":
    key = jax.random.PRNGKey(0)
    k1, k2, k3, k4, k5 = jax.random.split(key, 5)

    B, BEAM, V, H, T = 2, 4, 128, 32, 1      # small shapes, vocab = 128 lanes
    TEMP = 0.7
    model = CaptionModel(vocab_size=V - 1, max_seq_length=4, eos_idx=0)

    # raw decoder logits for B*BEAM rows
    raw_logits = jax.random.normal(k1, (B * BEAM, V), dtype=jnp.float32)

    # 1) log-softmax kernel (per-step normalization), incl. temperature + bf16
    logprobs = model.forward(raw_logits, 1.0, mode='log_softmax')
    ref_lp = jax.nn.log_softmax(raw_logits, axis=-1)
    assert np.allclose(np.asarray(logprobs), np.asarray(ref_lp), atol=1e-5)

    lp_t = model.forward(raw_logits, TEMP, mode='log_softmax')
    ref_lp_t = jax.nn.log_softmax(raw_logits / TEMP, axis=-1)
    assert np.allclose(np.asarray(lp_t), np.asarray(ref_lp_t), atol=1e-5)

    lp_bf16 = pallas_log_softmax(raw_logits.astype(jnp.bfloat16), 1.0)
    assert np.allclose(np.asarray(lp_bf16), np.asarray(ref_lp), atol=3e-2)

    # 2) greedy sample_next_word kernel
    it, slp = model.forward(logprobs, 'greedy', 1.0, mode='sample_next_word')
    ref_it = jnp.argmax(logprobs, axis=1)
    ref_slp = jnp.max(logprobs, axis=1)
    assert np.array_equal(np.asarray(it), np.asarray(ref_it))
    assert np.allclose(np.asarray(slp), np.asarray(ref_slp), atol=1e-6)

    # 3) standalone beam top-k kernel (pre-normalized logprobs)
    beam_logprobs_sum = 0.1 * jax.random.normal(k2, (B, BEAM), dtype=jnp.float32)
    lp3 = logprobs.reshape(B, BEAM, V)
    cand2d = (beam_logprobs_sum[:, :, None] + lp3).reshape(B, -1)
    ys2, ix2 = pallas_beam_topk(lp3, beam_logprobs_sum, BEAM)
    ref_ys2, _ = jax.lax.top_k(cand2d, BEAM)
    assert np.allclose(np.asarray(ys2), np.asarray(ref_ys2), atol=1e-5)
    gathered = jnp.take_along_axis(cand2d, ix2, axis=1)
    assert np.allclose(np.asarray(gathered), np.asarray(ys2), atol=1e-6)
    for row in np.asarray(ix2):
        assert len(np.unique(row)) == BEAM            # distinct selections

    # 4) FUSED beam step (raw logits -> log_softmax + top-k in one kernel), t=1
    beam_seq = jax.random.randint(k3, (B, BEAM, T), 0, V, dtype=jnp.int32)
    beam_seq_logprobs = jax.random.normal(k4, (B, BEAM, T, V), dtype=jnp.float32)
    state = [jax.random.normal(k5, (1, B * BEAM, H), dtype=jnp.float32)]

    new_seq, new_seq_lp, new_sum, new_state, step_lp = model.forward(
        raw_logits, BEAM, T,
        beam_seq, beam_seq_logprobs, beam_logprobs_sum, state,
        temperature=TEMP, mode='beam_step_fused')

    ref_cand = (beam_logprobs_sum[:, :, None]
                + ref_lp_t.reshape(B, BEAM, V)).reshape(B, -1)
    ref_ys, _ = jax.lax.top_k(ref_cand, BEAM)
    assert np.allclose(np.asarray(new_sum), np.asarray(ref_ys), atol=1e-5)
    assert np.allclose(np.asarray(step_lp), np.asarray(ref_lp_t), atol=1e-5)
    assert new_seq.shape == (B, BEAM, T + 1)
    assert new_seq_lp.shape == (B, BEAM, T + 1, V)
    assert new_state[0].shape == (1, B * BEAM, H)

    # 5) non-fused _beam_step path (API parity with the torch beam_step)
    ns2, nslp2, nsum2, nstate2 = model.forward(
        logprobs, logprobs, BEAM, T,
        beam_seq, beam_seq_logprobs, beam_logprobs_sum, state,
        mode='beam_step')
    assert np.allclose(np.asarray(nsum2), np.asarray(ref_ys2), atol=1e-5)
    assert ns2.shape == (B, BEAM, T + 1)

    jax.block_until_ready((logprobs, lp_t, it, slp, ys2, ix2,
                           new_seq, new_seq_lp, new_sum, new_state[0],
                           step_lp, ns2, nslp2, nsum2))
    print("KERNEL_OK")
</pallas_src>

<mosaic_0001>
module attributes {stable_mosaic.version = 11 : i64} {
  func.func @_log_softmax_kernel(%arg0: i32, %arg1: memref<8x128xf32, #tpu.memory_space<vmem>>, %arg2: memref<8x128xf32, #tpu.memory_space<vmem>>) attributes {dimension_semantics = [#tpu.dimension_semantics<parallel>], iteration_bounds = array<i64: 1>, scalar_prefetch = 0 : i64, scratch_operands = 0 : i64, tpu.core_type = #tpu.core_type<tc>, window_params = [{transform_indices = @transform_0, window_bounds = array<i64: 8, 128>}, {transform_indices = @transform_1, window_bounds = array<i64: 8, 128>}]} {
    %c0 = arith.constant 0 : index
    %c0_0 = arith.constant 0 : index
    %0 = vector.load %arg1[%c0, %c0_0] : memref<8x128xf32, #tpu.memory_space<vmem>>, vector<8x128xf32>
    %cst = arith.constant 1.000000e+00 : f32
    %1 = vector.broadcast %cst : f32 to vector<8x128xf32>
    %2 = arith.mulf %0, %1 : vector<8x128xf32>
    %cst_1 = arith.constant dense<0xFF800000> : vector<8xf32>
    %3 = vector.multi_reduction <maximumf>, %2, %cst_1 [1] : vector<8x128xf32> to vector<8xf32>
    %4 = vector.shape_cast %3 : vector<8xf32> to vector<8x1xf32>
    %5 = vector.broadcast %4 : vector<8x1xf32> to vector<8x128xf32>
    %6 = arith.subf %2, %5 : vector<8x128xf32>
    %7 = math.exp %6 : vector<8x128xf32>
    %8 = vector.broadcast %4 : vector<8x1xf32> to vector<8x128xf32>
    %9 = arith.subf %2, %8 : vector<8x128xf32>
    %cst_2 = arith.constant dense<0.000000e+00> : vector<8xf32>
    %10 = vector.multi_reduction <add>, %7, %cst_2 [1] : vector<8x128xf32> to vector<8xf32>
    %11 = vector.shape_cast %10 : vector<8xf32> to vector<8x1xf32>
    %12 = math.log %11 : vector<8x1xf32>
    %13 = vector.broadcast %12 : vector<8x1xf32> to vector<8x128xf32>
    %14 = arith.subf %9, %13 : vector<8x128xf32>
    %c0_3 = arith.constant 0 : index
    %c0_4 = arith.constant 0 : index
    %15 = vector.load %arg2[%c0_3, %c0_4] : memref<8x128xf32, #tpu.memory_space<vmem>>, vector<8x128xf32>
    tpu.vector_store %arg2[%c0_3, %c0_4], %14 {strides = array<i32>} : memref<8x128xf32, #tpu.memory_space<vmem>>, vector<8x128xf32>,
    return
  }
  func.func @transform_0(%arg0: i32) -> (i32, i32) {
    %c0_i32 = arith.constant 0 : i32
    %c0_i32_0 = arith.constant 0 : i32
    return %arg0, %c0_i32 : i32, i32
  }
  func.func @transform_1(%arg0: i32) -> (i32, i32) {
    %c0_i32 = arith.constant 0 : i32
    %c0_i32_0 = arith.constant 0 : i32
    return %arg0, %c0_i32 : i32, i32
  }
}

</mosaic_0001>

<bundles_post_ra>
// kernel: tpu_custom_call.1
= control target key start
LH: loop header
LB: loop body
LE: loop exit
PB: predicated region body
PF: predicated region fallthrough
CT: control target
= control target key end

     0   :  { %6 = vsyncpa [#allocation3], 0  ;;  %s128_s0 = inlined_call_operand.hbm [shape: f32[8,128], index: 0, kind: input, shape index: {}]   ;;  %s129_s1 = inlined_call_operand.hbm [shape: f32[8,128], index: 1, kind: output, shape index: {}]  }
   0x1   :  { %7 = vsyncpa [#allocation4], 0  ;;  %s13_s8 = sshll.u32 %s128_s0, 4  ;;  %s110_s9 = smov [#allocation2]   ;;  %s14_s8 = int_to_ptr.hbm [resolvable:$true] %s13_s8 }
   0x2   :  { %s15_s10 = sshll.u32 %s110_s9, 4  ;;  %s16_s10 = int_to_ptr.vmem [resolvable:$true] %s15_s10 }
   0x3   :  { %18 = dma.hbm_to_vmem [thread:$0]  %s14_s8, 128, %s16_s10, [#allocation3]  }
   0x4   :  { %106 = dma.done.wait [#allocation3], 128  }
   0x5   :  { %107 = vsyncadd [#allocation3], 4294967168  ;;  %v23_v0 = vld [vmem:[#allocation2] sm:$0xff]  ;;  %s111_s11 = smov [#allocation5]   ;;  %s42_s14 = sshll.u32 %s129_s1, 4  ;;  %s43_s14 = int_to_ptr.hbm [resolvable:$true] %s42_s14 }
   0x6   :  { %24 = vmax.xlane.f32.xlu0 %v23_v0  ;;  %s40_s0 = sshll.u32 %s111_s11, 4  ;;  %s41_s0 = int_to_ptr.vmem [resolvable:$true] %s40_s0 }
  0x79   :  { %v25_v1 = vpop.xlane.xlu0 %24 }
  0x7a   :  { %v26_v2 = vsub.f32 %v23_v0, %v25_v1 }
  0x7c   :  { %v27_v3 = vmul.f32 1.442695, %v26_v2 }
  0x7e   :  { %54 = vpow2.f32 %v27_v3 }
  0x84   :  { %v55_v4 = vpop.eup %54 }
  0x85   :  { %29 = vadd.xlane.f32.xlu0 %v55_v4 }
  0xf8   :  { %v30_v5 = vpop.xlane.xlu0 %29 }
  0xf9   :  { %56 = vlog2.f32 %v30_v5 }
  0xff   :  { %v57_v6 = vpop.eup %56 }
 0x100   :  { %v32_v7 = vmul.f32 0.6931472, %v57_v6 }
 0x102   :  { %v33_v8 = vsub.f32 %v26_v2, %v32_v7 }
 0x104   :  { %34 = vst [vmem:[#allocation5] sm:$0xff] %v33_v8 }
 0x105   :  { %45 = dma.vmem_to_hbm [thread:$0]  %s41_s0, 128, %s43_s14, [#allocation4]  }
 0x106   :  { %108 = dma.done.wait [#allocation4], 128  }
 0x107   :  { %109 = vsyncadd [#allocation4], 4294967168 }
 0x108   :  { %50 = vsyncpa [#allocation3], 1 }
 0x109   :  { %51 = vsyncpa [#allocation4], 1 }

</bundles_post_ra>
